<compile_context>
chip_gen: v7x
topology: tpu7x:2x2x1
jax: 0.10.0
libtpu: 0.0.40
codegen_flags: <defaults>
</compile_context>

<pallas_src>
import functools
import math

import jax
import jax.numpy as jnp
from jax.experimental import pallas as pl
from jax.experimental.pallas import tpu as pltpu

# Contract the last (TE) dim of both operands: (1, TE) x (TM, TE) -> (1, TM).
_NT_DIMS = (((1,), (1,)), ((), ()))

_VMEM_BUDGET = 40 * 1024 * 1024   # conservative: v7x has 64 MiB per TensorCore
_W1_BUDGET = 20 * 1024 * 1024     # resident-W1 threshold before chunking E_out


def _mlp_kernel(x_ref, w1_ref, b1_ref, w2_ref, b2_ref, o_ref):
    # x_ref : (TM, E)  input dtype (f32 ok; cast in-register below)
    # w1_ref: (E, TE)  bf16 chunk of W1^T columns
    # b1_ref: (1, TE)  f32
    # w2_ref: (1, TE)  bf16
    # b2_ref: (1, 1)   f32 scalar in SMEM
    # o_ref : (1, TM)  f32, lane-dense; doubles as the E_out accumulator
    j = pl.program_id(1)

    @pl.when(j == 0)
    def _init():
        o_ref[...] = jnp.zeros_like(o_ref) + b2_ref[0, 0]

    # Layer 1 on the MXU: bf16 operands, f32 accumulation.  The cast is VPU
    # work that hides under the MXU / DMA, so x streams from HBM as f32.
    x_bf = x_ref[...].astype(jnp.bfloat16)
    h = jnp.dot(x_bf, w1_ref[...], preferred_element_type=jnp.float32)
    h = jnp.maximum(h + b1_ref[...], 0.0)                        # (TM, TE) f32

    # Layer 2 (partial over this E_out chunk): contract TE of w2 with TE of h
    # -> lane-dense (1, TM) row.  bf16 operands keep v5e off the emulated
    # f32 MXU path; layer-2 FLOPs are E x smaller than layer 1 so any internal
    # operand shuffling stays hidden under the layer-1 matmul.
    y = jax.lax.dot_general(w2_ref[...], h.astype(jnp.bfloat16), _NT_DIMS,
                            preferred_element_type=jnp.float32)
    o_ref[...] += y


def _cdiv(a, b):
    return -(-a // b)


def _round_up(a, b):
    return _cdiv(a, b) * b


def _plan(N, E, block_rows):
    """Static (trace-time) tile planning: row tile, E_out chunk, VMEM need."""
    block_rows = max(128, _round_up(block_rows, 128))

    # ---- E_out chunk (second grid axis) so W1^T fits v7x VMEM -------------
    if E * E * 2 <= _W1_BUDGET or E % 128 != 0:
        # TODO(synk): a huge E that is not a multiple of 128 cannot be chunked
        # without masking the ragged chunk; keep W1 resident in that case.
        te, w1_bufs = E, 1
    else:
        te = None
        max_te = min(E, max(128, (_W1_BUDGET // (4 * E)) // 128 * 128))
        for cand in range(max_te, 127, -128):
            if E % cand == 0:
                te = cand
                break
        if te is None:
            te, w1_bufs = E, 1
        else:
            w1_bufs = 2               # chunk index changes -> double-buffer

    def vmem_need(tm):
        return (2 * tm * E * 4            # x tile, f32, double-buffered
                + w1_bufs * E * te * 2    # W1^T chunk(s), bf16
                + 2 * tm * te * 4         # h intermediate (+ slack)
                + 2 * tm * 4              # (1, TM) output, double-buffered
                + 8 * te * 4)             # b1 / w2 blocks

    # ---- row tile ----------------------------------------------------------
    if N <= 128:
        tm = N                            # exact single block, no raggedness
    else:
        tm = min(block_rows, (N // 128) * 128)
        while tm > 128 and vmem_need(tm) > _VMEM_BUDGET:
            tm -= 128
        # Keep both v7x TensorCores busy: aim for >= 2 row tiles when possible.
        if _cdiv(N, tm) < 2:
            half = _round_up(_cdiv(N, 2), 128)
            if 128 <= half < tm:
                tm = half

    return tm, te, w1_bufs, vmem_need(tm)


def _bspec(shape, index_map, *, buffers=None):
    """BlockSpec with optional pipeline depth; degrades gracefully."""
    if buffers is not None and hasattr(pl, "Buffered"):
        try:
            return pl.BlockSpec(shape, index_map,
                                pipeline_mode=pl.Buffered(buffers))
        except TypeError:                 # older jax: no pipeline_mode kwarg
            pass
    return pl.BlockSpec(shape, index_map)


def prepare_params(w1, b1, w2, b2, *, compute_dtype=jnp.bfloat16):
    """One-time (per weight update) prep: transpose + cast outside the hot path.

    w1: [E, E] (PyTorch [out, in]), b1: [E], w2: [1, E], b2: [1].
    """
    E = w1.shape[-1]
    w1_t = jnp.asarray(w1).T.astype(compute_dtype)            # (E_in, E_out)
    b1_r = jnp.asarray(b1).reshape(1, E).astype(jnp.float32)
    w2_r = jnp.asarray(w2).reshape(1, E).astype(compute_dtype)
    b2_r = jnp.asarray(b2).reshape(1, 1).astype(jnp.float32)
    return w1_t, b1_r, w2_r, b2_r


@functools.partial(jax.jit, static_argnames=("block_rows",))
def embedding2real_prepared(x, w1_t, b1_r, w2_r, b2_r, *, block_rows=1024):
    """x: [..., E] -> [..., 1], params from prepare_params()."""
    E = x.shape[-1]
    lead = x.shape[:-1]
    xf = x.reshape(-1, E)                    # no pad, no cast, no copy
    N = xf.shape[0]

    tm, te, w1_bufs, need = _plan(N, E, block_rows)
    n_i = _cdiv(N, tm)
    n_j = _cdiv(E, te)
    resident = (n_j == 1)
    # Single-buffer the constant-index operands only when the saving matters
    # (>= 1 MiB); tiny cases keep the plain, battle-tested BlockSpec path.
    single_buf = 1 if (resident and E * te * 2 >= (1 << 20)) else None

    cost = pl.CostEstimate(
        flops=2 * N * E * E + 2 * N * E,
        transcendentals=0,
        bytes_accessed=(N * E * x.dtype.itemsize            # x
                        + E * E * 2 * (1 if resident else n_i)  # W1 (re)fetch
                        + 3 * E * 4 + 4                      # b1, w2, b2
                        + N * 4),                            # output
    )

    vmem_limit = int(min(max(2 * need, 16 << 20), 48 << 20))

    out = pl.pallas_call(
        _mlp_kernel,
        out_shape=jax.ShapeDtypeStruct((1, N), jnp.float32),
        grid_spec=pltpu.PrefetchScalarGridSpec(
            num_scalar_prefetch=0,
            grid=(n_i, n_j),
            in_specs=[
                _bspec((tm, E), lambda i, j: (i, 0)),               # x row tile
                _bspec((E, te), lambda i, j: (0, j),
                       buffers=single_buf),                         # W1^T chunk
                _bspec((1, te), lambda i, j: (0, j),
                       buffers=single_buf),                         # b1 chunk
                _bspec((1, te), lambda i, j: (0, j),
                       buffers=single_buf),                         # w2 chunk
                pl.BlockSpec(memory_space=pltpu.MemorySpace.SMEM),  # b2 scalar
            ],
            out_specs=pl.BlockSpec((1, tm), lambda i, j: (0, i)),   # lane-dense
        ),
        compiler_params=pltpu.CompilerParams(
            dimension_semantics=("parallel", "arbitrary"),
            vmem_limit_bytes=vmem_limit,
        ),
        cost_estimate=cost,
    )(xf, w1_t, b1_r, w2_r, b2_r)

    return out[0].reshape(*lead, 1).astype(x.dtype)


def embedding2real(x, w1, b1, w2, b2, *, block_rows=1024):
    """Convenience wrapper taking raw PyTorch-layout params."""
    return embedding2real_prepared(x, *prepare_params(w1, b1, w2, b2),
                                   block_rows=block_rows)


def init_params(key, embedding_dim):
    """Deterministic init mimicking torch.nn.Linear default U[-1/sqrt(fan_in), +]."""
    k1, k2, k3, k4 = jax.random.split(key, 4)
    bound1 = 1.0 / math.sqrt(embedding_dim)
    w1 = jax.random.uniform(k1, (embedding_dim, embedding_dim), jnp.float32,
                            -bound1, bound1)
    b1 = jax.random.uniform(k2, (embedding_dim,), jnp.float32, -bound1, bound1)
    w2 = jax.random.uniform(k3, (1, embedding_dim), jnp.float32, -bound1, bound1)
    b2 = jax.random.uniform(k4, (1,), jnp.float32, -bound1, bound1)
    return w1, b1, w2, b2


if __name__ == "__main__":
    key = jax.random.PRNGKey(0)
    kx, kp = jax.random.split(key)

    batch, seq, embedding_dim = 2, 8, 32
    x = jax.random.normal(kx, (batch, seq, embedding_dim), jnp.float32)
    w1, b1, w2, b2 = init_params(kp, embedding_dim)

    params = prepare_params(w1, b1, w2, b2)     # once, outside the hot path
    y = embedding2real_prepared(x, *params)
    y = jax.block_until_ready(y)

    # Pure-JAX f32 reference, same math as the PyTorch module.
    ref = jnp.maximum(x @ w1.T + b1, 0.0) @ w2.T + b2

    assert y.shape == (batch, seq, 1), y.shape
    err = float(jnp.max(jnp.abs(y - ref)))
    # bf16 MXU operands with f32 accumulation -> loosened tolerance.
    assert err < 5e-2, f"max abs err {err}"
    print("KERNEL_OK")
</pallas_src>

<mosaic_0001>
module attributes {stable_mosaic.version = 11 : i64} {
  func.func @_mlp_kernel(%arg0: i32, %arg1: i32, %arg2: memref<16x32xf32, #tpu.memory_space<vmem>>, %arg3: memref<32x32xbf16, #tpu.memory_space<vmem>>, %arg4: memref<1x32xf32, #tpu.memory_space<vmem>>, %arg5: memref<1x32xbf16, #tpu.memory_space<vmem>>, %arg6: memref<1x1xf32, #tpu.memory_space<smem>>, %arg7: memref<1x16xf32, #tpu.memory_space<vmem>>) attributes {dimension_semantics = [#tpu.dimension_semantics<parallel>, #tpu.dimension_semantics<arbitrary>], iteration_bounds = array<i64: 1, 1>, scalar_prefetch = 0 : i64, scratch_operands = 0 : i64, tpu.core_type = #tpu.core_type<tc>, window_params = [{transform_indices = @transform_0, window_bounds = array<i64: 16, 32>}, {transform_indices = @transform_1, window_bounds = array<i64: 32, 32>}, {transform_indices = @transform_2, window_bounds = array<i64: 1, 32>}, {transform_indices = @transform_3, window_bounds = array<i64: 1, 32>}, {transform_indices = @transform_4, window_bounds = array<i64: 1, 1>}, {transform_indices = @transform_5, window_bounds = array<i64: 1, 16>}]} {
    %c0_i32 = arith.constant 0 : i32
    %0 = arith.cmpi eq, %arg1, %c0_i32 : i32
    %1 = arith.extui %0 : i1 to i32
    %c0_i32_0 = arith.constant 0 : i32
    %2 = arith.cmpi ne, %1, %c0_i32_0 : i32
    scf.if %2 {
      %cst_14 = arith.constant 0.000000e+00 : f32
      %18 = vector.broadcast %cst_14 : f32 to vector<1x16xf32>
      %c0_15 = arith.constant 0 : index
      %c0_16 = arith.constant 0 : index
      %19 = memref.load %arg6[%c0_15, %c0_16] : memref<1x1xf32, #tpu.memory_space<smem>>
      %20 = vector.broadcast %19 : f32 to vector<1x16xf32>
      %21 = arith.addf %18, %20 : vector<1x16xf32>
      %c0_17 = arith.constant 0 : index
      %c0_18 = arith.constant 0 : index
      %22 = vector.load %arg7[%c0_17, %c0_18] : memref<1x16xf32, #tpu.memory_space<vmem>>, vector<1x16xf32>
      tpu.vector_store %arg7[%c0_17, %c0_18], %21 {strides = array<i32>} : memref<1x16xf32, #tpu.memory_space<vmem>>, vector<1x16xf32>,
    } else {
    }
    %c0 = arith.constant 0 : index
    %c0_1 = arith.constant 0 : index
    %3 = vector.load %arg2[%c0, %c0_1] : memref<16x32xf32, #tpu.memory_space<vmem>>, vector<16x32xf32>
    %4 = arith.truncf %3 : vector<16x32xf32> to vector<16x32xbf16>
    %c0_2 = arith.constant 0 : index
    %c0_3 = arith.constant 0 : index
    %5 = vector.load %arg3[%c0_2, %c0_3] : memref<32x32xbf16, #tpu.memory_space<vmem>>, vector<32x32xbf16>
    %cst = arith.constant dense<0.000000e+00> : vector<16x32xf32>
    %6 = tpu.matmul %4, %5, %cst {dimension_numbers = #tpu.dot_dimension_numbers<[1], [0], [0], [1], [0, 0, 1, 1], [], []>} : vector<16x32xbf16>, vector<32x32xbf16>, vector<16x32xf32> -> vector<16x32xf32>
    %c0_4 = arith.constant 0 : index
    %c0_5 = arith.constant 0 : index
    %7 = vector.load %arg4[%c0_4, %c0_5] : memref<1x32xf32, #tpu.memory_space<vmem>>, vector<1x32xf32>
    %8 = vector.broadcast %7 : vector<1x32xf32> to vector<16x32xf32>
    %9 = arith.addf %6, %8 : vector<16x32xf32>
    %cst_6 = arith.constant 0.000000e+00 : f32
    %10 = vector.broadcast %cst_6 : f32 to vector<16x32xf32>
    %11 = arith.maximumf %9, %10 : vector<16x32xf32>
    %c0_7 = arith.constant 0 : index
    %c0_8 = arith.constant 0 : index
    %12 = vector.load %arg5[%c0_7, %c0_8] : memref<1x32xbf16, #tpu.memory_space<vmem>>, vector<1x32xbf16>
    %13 = arith.truncf %11 : vector<16x32xf32> to vector<16x32xbf16>
    %cst_9 = arith.constant dense<0.000000e+00> : vector<1x16xf32>
    %14 = tpu.matmul %12, %13, %cst_9 {dimension_numbers = #tpu.dot_dimension_numbers<[1], [1], [0], [0], [0, 0, 1, 0], [], []>} : vector<1x32xbf16>, vector<16x32xbf16>, vector<1x16xf32> -> vector<1x16xf32>
    %c0_10 = arith.constant 0 : index
    %c0_11 = arith.constant 0 : index
    %15 = vector.load %arg7[%c0_10, %c0_11] : memref<1x16xf32, #tpu.memory_space<vmem>>, vector<1x16xf32>
    %16 = arith.addf %15, %14 : vector<1x16xf32>
    %c0_12 = arith.constant 0 : index
    %c0_13 = arith.constant 0 : index
    %17 = vector.load %arg7[%c0_12, %c0_13] : memref<1x16xf32, #tpu.memory_space<vmem>>, vector<1x16xf32>
    tpu.vector_store %arg7[%c0_12, %c0_13], %16 {strides = array<i32>} : memref<1x16xf32, #tpu.memory_space<vmem>>, vector<1x16xf32>,
    return
  }
  func.func @transform_0(%arg0: i32, %arg1: i32) -> (i32, i32) {
    %c0_i32 = arith.constant 0 : i32
    %c0_i32_0 = arith.constant 0 : i32
    return %arg0, %c0_i32 : i32, i32
  }
  func.func @transform_1(%arg0: i32, %arg1: i32) -> (i32, i32) {
    %c0_i32 = arith.constant 0 : i32
    %c0_i32_0 = arith.constant 0 : i32
    return %c0_i32, %arg1 : i32, i32
  }
  func.func @transform_2(%arg0: i32, %arg1: i32) -> (i32, i32) {
    %c0_i32 = arith.constant 0 : i32
    %c0_i32_0 = arith.constant 0 : i32
    return %c0_i32, %arg1 : i32, i32
  }
  func.func @transform_3(%arg0: i32, %arg1: i32) -> (i32, i32) {
    %c0_i32 = arith.constant 0 : i32
    %c0_i32_0 = arith.constant 0 : i32
    return %c0_i32, %arg1 : i32, i32
  }
  func.func @transform_4(%arg0: i32, %arg1: i32) -> (i32, i32) {
    %c0_i32 = arith.constant 0 : i32
    %c0_i32_0 = arith.constant 0 : i32
    %c0_i32_1 = arith.constant 0 : i32
    return %c0_i32, %c0_i32_0 : i32, i32
  }
  func.func @transform_5(%arg0: i32, %arg1: i32) -> (i32, i32) {
    %c0_i32 = arith.constant 0 : i32
    %c0_i32_0 = arith.constant 0 : i32
    return %c0_i32, %arg0 : i32, i32
  }
}

</mosaic_0001>

<bundles_post_ra>
// kernel: squeeze.1
= control target key start
LH: loop header
LB: loop body
LE: loop exit
PB: predicated region body
PF: predicated region fallthrough
CT: control target
= control target key end

     0   :  { %s85_s0 = inlined_call_operand.vmem [shape: f32[16], index: 0, kind: input, shape index: {}]   ;;  %s86_s1 = inlined_call_operand.hbm [shape: f32[2,8,1], index: 1, kind: output, shape index: {}]  }
   0x1   :  { %v5_v0 = vld [vmem:[%s85_s0] sm:$0x1] }
   0x2   :  { %2 = vsyncpa [#allocation1], 0  ;;  %6 = vst [vmem:[#allocation3] sm:$0x1] %v5_v0  ;;  %vm8_vm0 = vcmask 64512   ;;  %s58_s0 = smov 120  }
   0x3   :  { %s59_s8 = smov [#allocation0]  }
   0x4   :  { %s26_s9 = sshll.u32 %s59_s8, 4  ;;  %s27_s9 = int_to_ptr.vmem [resolvable:$true] %s26_s9 }
   0x5   :  { %s34_s10 = scalar_lea.vmem %s27_s9, 32  ;;  %p39_p1 = scmp.lt.s32.totalorder %s27_s9, %s27_s9 }
   0x6   :  { %p35_p0 = scmp.ne.s32.totalorder %s27_s9, %s34_s10  ;;  %p40_p2 = scmp.lt.s32.totalorder %s34_s10, %s34_s10 }
   0x8   :  { %p41_p3 = por %p40_p2, %p39_p1 }
   0x9   :  { %v10_v1 = vld [vmem:[#allocation3] sm:$0x1]  }
   0xa   :  { %v7_v2 = vld [vmem:[#allocation3] sm:$0x1]   ;;  %11 = vrot.lane.b32.xlu0 %v10_v1, %s58_s0  ;;  %p42_p4 = pnand %p41_p3, %p35_p0 }
   0xb   :  { %9 = vst.msk [vmem:[#allocation2] sm:$0x1] %vm8_vm0, %v7_v2  }
  0x7c   :  { %v12_v3 = vpop.permute.xlu0 %11  }
  0x7d   :  { %15 = vst.msk [vmem:[#allocation2 + $0x1] sm:$0x1] %vm8_vm0, %v12_v3  }
  0x84   :  { %v19_v4 = vld [vmem:[#allocation2] sm:$0x3] }
  0x85   :  { %21 = vst [vmem:[#allocation0] sm:$0x3] %v19_v4 }
  0x86   :  { %45 = shalt.err (!%p42_p4)
}
  0x87   :  { %s46_s13 = scalar_lea.hbm %s86_s1, 32 }
  0x88   :  { %p47_p5 = scmp.ne.s32.totalorder %s86_s1, %s46_s13  ;;  %p50_p6 = scmp.lt.u32.totalorder %s46_s13, %s86_s1 }
  0x8a   :  { %p52_p7 = pnand %p50_p6, %p47_p5 }
  0x8c   :  { %55 = shalt.err (!%p52_p7)
}
  0x8d   :  { %29 = dma.vmem_to_hbm [thread:$0]  %s27_s9, 32, %s86_s1, [#allocation1]  }
  0x8e   :  { %56 = dma.done.wait [#allocation1], 32  }
  0x8f   :  { %57 = vsyncadd [#allocation1], 4294967264 }
  0x90   :  { %31 = vsyncpa [#allocation1], 1 }

// kernel: embedding2real_prepared.1
= control target key start
LH: loop header
LB: loop body
LE: loop exit
PB: predicated region body
PF: predicated region fallthrough
CT: control target
= control target key end

     0   :  { %11 = vsyncpa [#allocation4], 0  ;;  %s357_s0 = inlined_call_operand.hbm [shape: f32[16,32], index: 0, kind: input, shape index: {}]   ;;  %s358_s1 = inlined_call_operand.hbm [shape: bf16[32,32], index: 1, kind: input, shape index: {}]   ;;  %s359_s2 = inlined_call_operand.vmem [shape: f32[1,32], index: 2, kind: input, shape index: {}]   ;;  %s360_s3 = inlined_call_operand.vmem [shape: bf16[1,32], index: 3, kind: input, shape index: {}]   ;;  %s361_s4 = inlined_call_operand.<no memory space> [shape: f32[1,1], index: 4, kind: input, shape index: {}]   ;;  %s362_s5 = inlined_call_operand.vmem [shape: f32[1,16], index: 5, kind: output, shape index: {}]  }
   0x1   :  { %12 = vsyncpa [#allocation6], 0  ;;  %s272_s18 = smov [#allocation3]   ;;  %s224_s22 = scalar_lea.hbm %s357_s0, 256 }
   0x2   :  { %s18_s19 = sshll.u32 %s272_s18, 4  ;;  %p225_p0 = scmp.ne.s32.totalorder %s357_s0, %s224_s22  ;;  %s19_s19 = int_to_ptr.vmem [resolvable:$true] %s18_s19 }
   0x3   :  { %p228_p1 = scmp.lt.u32.totalorder %s224_s22, %s357_s0 }
   0x5   :  { %p230_p2 = pnand %p228_p1, %p225_p0 }
   0x7   :  { %233 = shalt.err (!%p230_p2)
}
   0x8   :  { %s234_s27 = scalar_lea.vmem %s19_s19, 256  ;;  %p239_p4 = scmp.lt.s32.totalorder %s19_s19, %s19_s19 }
   0x9   :  { %p235_p3 = scmp.ne.s32.totalorder %s19_s19, %s234_s27  ;;  %p240_p5 = scmp.lt.s32.totalorder %s234_s27, %s234_s27 }
   0xb   :  { %p241_p6 = por %p240_p5, %p239_p4 }
   0xd   :  { %p242_p7 = pnand %p241_p6, %p235_p3 }
   0xf   :  { %245 = shalt.err (!%p242_p7)
}
  0x10   :  { %s273_s28 = smov 128   ;;  %s274_s29 = smov 8  }
  0x11   :  { %24 = dma.hbm_to_vmem [thread:$0]  %s357_s0, 256, %s19_s19, [#allocation4], %s273_s28, %s273_s28, %s274_s29  }
  0x12   :  { %s275_s7 = smov [#allocation5]   ;;  %s246_s11 = scalar_lea.hbm %s358_s1, 256 }
  0x13   :  { %s30_s8 = sshll.u32 %s275_s7, 4  ;;  %p247_p8 = scmp.ne.s32.totalorder %s358_s1, %s246_s11  ;;  %s31_s8 = int_to_ptr.vmem [resolvable:$true] %s30_s8 }
  0x14   :  { %p250_p9 = scmp.lt.u32.totalorder %s246_s11, %s358_s1 }
  0x16   :  { %p252_p10 = pnand %p250_p9, %p247_p8 }
  0x18   :  { %255 = shalt.err (!%p252_p10)
}
  0x19   :  { %s256_s16 = scalar_lea.vmem %s31_s8, 256  ;;  %p261_p12 = scmp.lt.s32.totalorder %s31_s8, %s31_s8 }
  0x1a   :  { %p257_p11 = scmp.ne.s32.totalorder %s31_s8, %s256_s16  ;;  %p262_p13 = scmp.lt.s32.totalorder %s256_s16, %s256_s16 }
  0x1c   :  { %p263_p0 = por %p262_p13, %p261_p12 }
  0x1e   :  { %p264_p1 = pnand %p263_p0, %p257_p11 }
  0x20   :  { %267 = shalt.err (!%p264_p1)
}
  0x21   :  { %s276_s0 = smov 64   ;;  %s277_s17 = smov 4  }
  0x22   :  { %36 = dma.hbm_to_vmem [thread:$0]  %s358_s1, 256, %s31_s8, [#allocation6], %s276_s0, %s276_s0, %s277_s17  }
  0x23   :  { %268 = dma.done.wait [#allocation4], 256  }
  0x24   :  { %269 = vsyncadd [#allocation4], 4294967040 }
  0x25   :  { %270 = dma.done.wait [#allocation6], 256  }
  0x26   :  { %271 = vsyncadd [#allocation6], 4294967040  ;;  %v278_v0 = vmov 0.0   ;;  %vm279_vm0 = vmmov 0   ;;  %v222_v1 = vld [vmem:[#allocation5] sm:$0xff]   ;;  %v223_v2 = vld [vmem:[#allocation5 + $0x8] sm:$0xff]   ;;  %v55_v6 = vstv %s361_s4 }
  0x27   :  { %200 = vmatprep.subr.bf16.mxu0 %v278_v0  ;;  %204 = vmatprep.mubr.msk.bf16.mxu0 %vm279_vm0, %v278_v0  ;;  %v59_v3 = vld [vmem:[#allocation3] sm:$0xff]  ;;  %v60_v4 = vld [vmem:[#allocation3 + $0x8] sm:$0xff]  ;;  %vm85_vm1 = vcmask 261120   ;;  %vm57_vm2 = vcmask 122880  }
  0x28   :  { %208 = vmatprep.subr.bf16.mxu1 %v278_v0  ;;  %210 = vmatprep.mubr.msk.bf16.mxu1 %vm279_vm0, %v278_v0  ;;  %v61_v5 = vpack.c.bf16 %v60_v4, %v59_v3  ;;  %58 = vst.msk [vmem:[%s362_s5] sm:$0x1] %vm57_vm2, %v55_v6  ;;  %v190_v7 = vld [vmem:[%s359_s2] ss:$0 sm:$0xff] }
  0x29   :  { %201 = vmatpush3.bf16.msra.mxu0 %v222_v1  ;;  %v132_v18 = vld [vmem:[%s360_s3] sm:$0x1] }
  0x2a   :  { %202 = vmatprep.subr.bf16.mxu0 %v278_v0 }
  0x2d   :  { %203 = vmatpush3.bf16.msra.mxu0 %v223_v2 }
  0x2f   :  { %v180_v19 = vld [vmem:[%s362_s5] sm:$0x1] }
  0x30   :  { %205 = vmatmul.mubr.msk.bf16.vlgmr.msra.gmra.mrb[0].mxu0 %vm85_vm1, %v61_v5 }
 0x103   :  { %v123_v8 = vpop.f32.mrb[0].mxu0 }
 0x104   :  { %v124_v9 = vadd.f32 %v190_v7, %v123_v8  ;;  %v206_v10 = vpop.f32.mrb[1].mxu0 }
 0x105   :  { %v126_v11 = vpop.f32.mrb[2].mxu0 }
 0x106   :  { %v127_v12 = vadd.f32 %v190_v7, %v126_v11  ;;  %v207_v13 = vpop.f32.mrb[3].mxu0  ;;  %v130_v14 = vmax.f32 %v124_v9, 0.0 }
 0x108   :  { %v131_v15 = vmax.f32 %v127_v12, 0.0 }
 0x10a   :  { %v133_v16 = vpack.c.bf16 %v131_v15, %v130_v14 }
 0x10c   :  { %v138_v17 = vsel %vm85_vm1, %v133_v16, 0 }
 0x10d   :  { %209 = vmatpush3.bf16.xpose.msra.mxu1 %v138_v17 }
 0x114   :  { %211 = vmatmul.mubr.msk.bf16.vlgmr.msra.gmra.mrb[0].mxu1 %vm85_vm1, %v132_v18 }
 0x1e7   :  { %v174_v20 = vpop.f32.mrb[0].mxu1 }
 0x1e8   :  { %v181_v21 = vadd.f32 %v180_v19, %v174_v20  ;;  %v212_v22 = vpop.f32.mrb[1].mxu1 }
 0x1e9   :  { %v177_v23 = vpop.f32.mrb[2].mxu1 }
 0x1ea   :  { %183 = vst.msk [vmem:[%s362_s5] sm:$0x1] %vm57_vm2, %v181_v21  ;;  %v213_v24 = vpop.f32.mrb[3].mxu1 }
 0x1eb   :  { %188 = vsyncpa [#allocation4], 1 }
 0x1ec   :  { %189 = vsyncpa [#allocation6], 1 }

</bundles_post_ra>
